<compile_context>
chip_gen: v7x
topology: tpu7x:2x2x1
jax: 0.10.0
libtpu: 0.0.40
codegen_flags: <defaults>
</compile_context>

<pallas_src>
import functools
import math

import jax
import jax.numpy as jnp
from jax.experimental import pallas as pl
from jax.experimental.pallas import tpu as pltpu


def _pe_add_kernel(x_ref, pe_ref, o_ref):
    # x_ref: (tile_s, B, D); pe_ref: (tile_s, 1, D) float32; o_ref: (tile_s, B, D).
    # Broadcast-add over the batch (sublane) axis, promote to f32, cast once out.
    o_ref[...] = (x_ref[...].astype(jnp.float32) + pe_ref[...]).astype(o_ref.dtype)


@functools.lru_cache(maxsize=8)
def _pe_table(seq_len, d_model):
    """Sinusoidal table (seq_len, 1, d_model) float32 — the PyTorch buffer."""
    position = jnp.arange(seq_len, dtype=jnp.float32)[:, None]          # (S, 1)
    div_term = jnp.exp(jnp.arange(0, d_model, 2, dtype=jnp.float32)
                       * (-math.log(10000.0) / d_model))                # (D/2,)
    pe = jnp.zeros((seq_len, d_model), dtype=jnp.float32)
    pe = pe.at[:, 0::2].set(jnp.sin(position * div_term))
    pe = pe.at[:, 1::2].set(jnp.cos(position * div_term))
    return pe[:, None, :]                                               # (S, 1, D)


def _pick_tile_s(seq_len, batch, d_model, itemsize, target_bytes=4 << 20):
    # ~4 MiB blocks (sized by the f32 path): big enough to amortize per-step
    # overhead, small enough that double-buffered in+out+pe plus f32
    # intermediates stays well under the 48 MiB limit on every generation.
    bytes_per_row = batch * d_model * max(itemsize, 4)
    tile = max(1, target_bytes // bytes_per_row)
    # Keep >= 2 grid steps so the "parallel" axis shards across the two
    # TensorCores on v7x and the pipeline has something to overlap.
    if seq_len >= 2:
        tile = min(tile, -(-seq_len // 2))
    if tile >= 8:
        tile = (tile // 8) * 8  # even, sublane-friendly blocks
    return int(max(1, min(tile, seq_len)))


def positional_encoding(x, max_len=5000, tile_s=None, in_place=False):
    """x: (seq_len, batch, d_model). Returns x + pe[:seq_len] broadcast over batch."""
    s, b, d = x.shape
    assert s <= max_len, "sequence length exceeds max_len"

    # PyTorch adds a float32 buffer -> output promotes to float32 for bf16/fp8 x.
    out_dtype = jnp.promote_types(x.dtype, jnp.float32)
    pe = _pe_table(s, d)                                                # (S, 1, D) f32

    if tile_s is None:
        tile_s = _pick_tile_s(s, b, d, jnp.dtype(out_dtype).itemsize)
    tile_s = int(max(1, min(tile_s, s)))
    grid = (pl.cdiv(s, tile_s),)

    # In-place add (donate x) only when shapes/dtypes allow exact aliasing.
    aliases = {0: 0} if (in_place and out_dtype == x.dtype) else {}

    return pl.pallas_call(
        _pe_add_kernel,
        out_shape=jax.ShapeDtypeStruct((s, b, d), out_dtype),
        grid=grid,
        in_specs=[
            pl.BlockSpec((tile_s, b, d), lambda i: (i, 0, 0)),
            pl.BlockSpec((tile_s, 1, d), lambda i: (i, 0, 0)),
        ],
        out_specs=pl.BlockSpec((tile_s, b, d), lambda i: (i, 0, 0)),
        input_output_aliases=aliases,
        compiler_params=pltpu.CompilerParams(
            dimension_semantics=("parallel",),
            vmem_limit_bytes=48 << 20,   # explicit: v5e default scoped is 16 MiB
        ),
    )(x, pe)


def _reference_pe(seq_len, d_model):
    """Plain-JAX reproduction of the PyTorch buffer, for verification only."""
    position = jnp.arange(seq_len, dtype=jnp.float32)[:, None]
    div_term = jnp.exp(jnp.arange(0, d_model, 2, dtype=jnp.float32)
                       * (-math.log(10000.0) / d_model))
    pe = jnp.zeros((seq_len, d_model), dtype=jnp.float32)
    pe = pe.at[:, 0::2].set(jnp.sin(position * div_term))
    pe = pe.at[:, 1::2].set(jnp.cos(position * div_term))
    return pe[:, None, :]


if __name__ == "__main__":
    key = jax.random.PRNGKey(0)

    # Primary small test consistent with the module: (seq, batch, d_model).
    s, b, d = 8, 2, 32
    x = jax.random.normal(key, (s, b, d), dtype=jnp.float32)
    expected = x + _reference_pe(s, d)            # computed before x is donated
    out = jax.block_until_ready(positional_encoding(x, in_place=True))
    assert out.shape == (s, b, d) and out.dtype == jnp.float32
    assert jnp.allclose(out, expected, atol=1e-4, rtol=1e-5)

    # Multi-tile pipelined grid, partial last block, lane-dense d_model, and a
    # bf16 input (output promotes to float32, matching the PyTorch buffer add).
    s2, b2, d2 = 50, 4, 128
    x2 = jax.random.normal(jax.random.PRNGKey(1), (s2, b2, d2), dtype=jnp.bfloat16)
    out2 = jax.block_until_ready(positional_encoding(x2, tile_s=16))
    expected2 = x2.astype(jnp.float32) + _reference_pe(s2, d2)
    assert out2.shape == (s2, b2, d2) and out2.dtype == jnp.float32
    assert jnp.allclose(out2, expected2, atol=1e-4, rtol=1e-5)

    print("KERNEL_OK")
</pallas_src>

<mosaic_0001>
module attributes {stable_mosaic.version = 11 : i64} {
  func.func @_pe_add_kernel(%arg0: i32, %arg1: memref<4x2x32xf32, #tpu.memory_space<vmem>>, %arg2: memref<4x1x32xf32, #tpu.memory_space<vmem>>, %arg3: memref<4x2x32xf32, #tpu.memory_space<vmem>>) attributes {dimension_semantics = [#tpu.dimension_semantics<parallel>], iteration_bounds = array<i64: 2>, scalar_prefetch = 0 : i64, scratch_operands = 0 : i64, tpu.core_type = #tpu.core_type<tc>, window_params = [{transform_indices = @transform_0, window_bounds = array<i64: 4, 2, 32>}, {transform_indices = @transform_1, window_bounds = array<i64: 4, 1, 32>}, {transform_indices = @transform_2, window_bounds = array<i64: 4, 2, 32>}]} {
    %c0 = arith.constant 0 : index
    %c0_0 = arith.constant 0 : index
    %c0_1 = arith.constant 0 : index
    %0 = vector.load %arg1[%c0, %c0_0, %c0_1] : memref<4x2x32xf32, #tpu.memory_space<vmem>>, vector<4x2x32xf32>
    %c0_2 = arith.constant 0 : index
    %c0_3 = arith.constant 0 : index
    %c0_4 = arith.constant 0 : index
    %1 = vector.load %arg2[%c0_2, %c0_3, %c0_4] : memref<4x1x32xf32, #tpu.memory_space<vmem>>, vector<4x1x32xf32>
    %2 = vector.broadcast %1 : vector<4x1x32xf32> to vector<4x2x32xf32>
    %3 = arith.addf %0, %2 : vector<4x2x32xf32>
    %c0_5 = arith.constant 0 : index
    %c0_6 = arith.constant 0 : index
    %c0_7 = arith.constant 0 : index
    %4 = vector.load %arg3[%c0_5, %c0_6, %c0_7] : memref<4x2x32xf32, #tpu.memory_space<vmem>>, vector<4x2x32xf32>
    tpu.vector_store %arg3[%c0_5, %c0_6, %c0_7], %3 {strides = array<i32>} : memref<4x2x32xf32, #tpu.memory_space<vmem>>, vector<4x2x32xf32>,
    return
  }
  func.func @transform_0(%arg0: i32) -> (i32, i32, i32) {
    %c0_i32 = arith.constant 0 : i32
    %c0_i32_0 = arith.constant 0 : i32
    %c0_i32_1 = arith.constant 0 : i32
    return %arg0, %c0_i32, %c0_i32_0 : i32, i32, i32
  }
  func.func @transform_1(%arg0: i32) -> (i32, i32, i32) {
    %c0_i32 = arith.constant 0 : i32
    %c0_i32_0 = arith.constant 0 : i32
    %c0_i32_1 = arith.constant 0 : i32
    return %arg0, %c0_i32, %c0_i32_0 : i32, i32, i32
  }
  func.func @transform_2(%arg0: i32) -> (i32, i32, i32) {
    %c0_i32 = arith.constant 0 : i32
    %c0_i32_0 = arith.constant 0 : i32
    %c0_i32_1 = arith.constant 0 : i32
    return %arg0, %c0_i32, %c0_i32_0 : i32, i32, i32
  }
}

</mosaic_0001>

<bundles_post_ra>
// kernel: tpu_custom_call.1
= control target key start
LH: loop header
LB: loop body
LE: loop exit
PB: predicated region body
PF: predicated region fallthrough
CT: control target
= control target key end

     0   :  { %7 = vsyncpa [#allocation3], 0  ;;  %s680_s0 = inlined_call_operand.hbm [shape: f32[8,2,32], index: 0, kind: input, shape index: {}, may-alias: {0,2}]   ;;  %s681_s1 = inlined_call_operand.vmem [shape: f32[8,1,32], index: 1, kind: input, shape index: {}]   ;;  %s682_s2 = inlined_call_operand.hbm [shape: f32[8,2,32], index: 2, kind: output, shape index: {}, may-alias: {0,2}]  }
   0x1   :  { %9 = vsyncpa [#allocation3 + $0x1], 0 }
   0x2   :  { %10 = vsyncpa [#allocation4], 0 }
   0x3   :  { %12 = vsyncpa [#allocation4 + $0x1], 0  ;;  %s510_s9 = smov 0   ;;  %s512_s10 = smov 0  }
   0x4   :  { %s514_s11 = smov 0   ;;  %s516_s12 = smov 0  }
   0x5 LB: > { %s531_s13 = sadd.s32 4294967295, %s487_s12   ;;  %s320_s14 = sadd.s32 4294967294, %s487_s12   ;;  %s487_s12 = sphi %s516_s12, %s695_s12   ;;  %s483_s11 = sphi %s514_s11, %s694_s11   ;;  %s479_s10 = sphi %s512_s10, %s693_s10   ;;  %s475_s9 = sphi %s510_s9, %s692_s9  }
   0x6   : > { %s535_s15 = sadd.s32 1, %s487_s12   ;;  %s25_s16 = sadd.s32 1, %s483_s11 }
   0x7   : > { %s22_s17 = ssub.s32 %s487_s12, %s535_s15  ;;  %p32_p0 = scmp.ne.s32.totalorder %s483_s11, %s479_s10 }
   0x8   : > { %p23_p1 = scmp.eq.s32.totalorder %s22_s17, 0  ;;  %p33_p2 = scmp.eq.s32.totalorder %s487_s12, 0 }
   0x9   : > { %p38_p3 = scmp.ne.s32.totalorder %s479_s10, %s475_s9  ;;  %p39_p4 = scmp.eq.s32.totalorder %s531_s13, 0 }
   0xa   : > { %s547_s18 = scalar_select %p23_p1, %s483_s11, %s25_s16  }
   0xb   : > { %p549_p5 = por %p33_p2, %p32_p0  ;;  %p553_p6 = por %p39_p4, %p38_p3 }
   0xc   : > { %p88_p7 = scmp.eq.s32.totalorder %s531_s13, 1  ;;  %p94_p8 = scmp.eq.s32.totalorder %s320_s14, 1 }
   0xd   : > { %p353_p10 = scmp.lt.s32.totalorder %s487_s12, 2  ;;  %s114_s23 = sand.u32 1, %s483_s11  }
   0xe   : > { %p560_p11 = por %p88_p7, %p32_p0  ;;  %p564_p12 = por %p94_p8, %p38_p3 }
   0xf   : > { %s339_s24 = sshll.u32 %s487_s12, 7  ;;  %s323_s25 = sshll.u32 %s114_s23, 3 }
  0x10   : > { %s686_s21 = scalar_select %p560_p11, 1, 0 }
  0x11   : > { %s687_s22 = scalar_select %p564_p12, 1, 0 }
  0x12   : > { %s573_s28 = scalar_lea.hbm %s680_s0, %s339_s24  ;;  %s118_s29 = scalar_lea.vmem [#allocation2], %s323_s25 }
  0x13   : > { %s125_s30 = sshll.u32 %s118_s29, 4  ;;  %p577_p13 = pnand %p353_p10, %p549_p5  ;;  %s581_s30 = int_to_ptr.vmem [resolvable:$true] %s125_s30 }
  0x14   : > { %s583_s4 = scalar_lea.sflag [#allocation3], %s114_s23  ;;  %s391_s5 = scalar_lea.hbm %s573_s28, 128 }
  0x15   : > { %p392_p0 = scmp.ne.s32.totalorder %s573_s28, %s391_s5  ;;  %p393_p1 = pneg %p577_p13 }
  0x16   : > { %s396_s8 = scalar_lea.hbm %s680_s0, 256  ;;  %p397_p4 = scmp.lt.u32.totalorder %s573_s28, %s680_s0 }
  0x17   : > { %p394_p2 = pnand %p393_p1, %p392_p0  ;;  %p398_p5 = scmp.lt.u32.totalorder %s396_s8, %s391_s5 }
  0x18   : > { %p400_p8 = scmp.lt.u32.totalorder %s391_s5, %s573_s28 }
  0x19   : > { %p395_p3 = pneg %p394_p2  ;;  %p399_p7 = por %p398_p5, %p397_p4 }
  0x1b   : > { %p401_p10 = por %p400_p8, %p399_p7 }
  0x1d   : > { %p402_p9 = pnand %p401_p10, %p395_p3 }
  0x1f   : > { %405 = shalt.err (!%p402_p9)
}
  0x20   : > { %s406_s17 = scalar_lea.vmem %s581_s30, 128  ;;  %s489_s19 = smov [#allocation2]  }
  0x21   : > { %p407_p0 = scmp.ne.s32.totalorder %s581_s30, %s406_s17  ;;  %s411_s23 = sshll.u32 %s489_s19, 4  ;;  %s412_s23 = int_to_ptr.vmem [resolvable:$false] %s411_s23 }
  0x22   : > { %s413_s24 = scalar_lea.vmem %s412_s23, 256  ;;  %p414_p11 = scmp.lt.s32.totalorder %s581_s30, %s412_s23 }
  0x23   : > { %p409_p2 = pnand %p407_p0, %p393_p1  ;;  %p415_p4 = scmp.lt.s32.totalorder %s413_s24, %s406_s17 }
  0x25   : > { %p410_p12 = pneg %p409_p2  ;;  %p416_p5 = por %p415_p4, %p414_p11 }
  0x27   : > { %p417_p7 = pnand %p416_p5, %p410_p12 }
  0x29   : > { %420 = shalt.err (!%p417_p7)
}
  0x2a   : > { %s490_s25 = smov 32   ;;  %s491_s26 = smov 2  }
  0x2b   : > { %348 = dma.hbm_to_vmem [thread:$0]  (!%p577_p13), %s573_s28, 128, %s581_s30, %s583_s4, %s490_s25, %s490_s25, %s491_s26  }
  0x2c   : > { %p326_p9 = scmp.ge.s32.totalorder %s487_s12, 1  ;;  %p141_p1 = scmp.lt.s32.totalorder %s487_s12, 3 }
  0x2e   : > { %p142_p3 = pnand %p326_p9, %p141_p1 }
  0x2f   : > { %s614_s27 = sand.u32 (!%p142_p3), 1, %s479_s10  }
  0x30   : > { %145 = sbr.rel (%p142_p3) target bundleno = 85 (0x55), region = 28  ;;  %s327_s29 = sshll.u32 (!%p142_p3), %s614_s27, 3 }
  0x31   : > { %s148_s5 = scalar_lea.sflag (!%p142_p3), [#allocation3], %s614_s27  ;;  %s151_s6 = scalar_lea.vmem (!%p142_p3), [#allocation2], %s327_s29 }
  0x37   : > { %466 = dma.done.wait (%p553_p6), %s148_s5, 128  }
  0x38   : > { %468 = vsyncadd (%p553_p6), %s148_s5, 4294967168  ;;  %s329_s28 = sshll.u32 %s531_s13, 2  ;;  %s175_s7 = scalar_lea.vmem [#allocation5], %s327_s29  ;;  %vm219_vm0 = vcmask 254976   ;;  %v183_v0 = vld [vmem:[%s151_s6] sm:$0x3] }
  0x39   : > { %p178_p11 = scmp.lt.s32.totalorder %s329_s28, 7  ;;  %s238_s8 = sshll.u32 %s175_s7, 4  ;;  %v184_v2 = vld [vmem:[%s151_s6 + $0x2] sm:$0x3]  ;;  %v185_v5 = vld [vmem:[%s151_s6 + $0x4] sm:$0x3]  ;;  %s627_s8 = int_to_ptr.vmem [resolvable:$true] %s238_s8 }
  0x3a   : > { %s340_s14 = sshll.u32 %s531_s13, 7  ;;  %v186_v9 = vld [vmem:[%s151_s6 + $0x6] sm:$0x3]  ;;  %s225_s17 = scalar_lea.sflag [#allocation4], %s614_s27 }
  0x3b   : > { %s697_s28 = smov (!%p178_p11, %s329_s28), 7  ;;  %s633_s16 = scalar_lea.hbm %s682_s2, %s340_s14 }
  0x3c   : > { %s180_s4 = scalar_lea.vmem %s681_s1, %s697_s28  ;;  %s421_s19 = scalar_lea.vmem %s627_s8, 128 }
  0x3d   : > { %v330_v1 = vld [vmem:[%s180_s4] ss:$0 sm:$0xff]  ;;  %v331_v4 = vld [vmem:[%s180_s4 + $0x1] ss:$0 sm:$0xff]  ;;  %v332_v6 = vld [vmem:[%s180_s4 + $0x2] ss:$0 sm:$0xff]  ;;  %p422_p6 = scmp.ne.s32.totalorder %s627_s8, %s421_s19 }
  0x3e   : > { %v215_v3 = vadd.f32 %v330_v1, %v183_v0  ;;  %v216_v7 = vadd.f32 %v331_v4, %v184_v2  ;;  %v217_v8 = vadd.f32 %v332_v6, %v185_v5  ;;  %v333_v10 = vld [vmem:[%s180_s4 + $0x3] ss:$0 sm:$0xff]  ;;  %p689_p12 = scmp.ne.s32.totalorder %s686_s21, 0  ;;  %s492_s23 = smov [#allocation5]  }
  0x3f   : > { %v218_v11 = vadd.f32 %v333_v10, %v186_v9  ;;  %s425_s24 = sshll.u32 %s492_s23, 4  ;;  %s426_s24 = int_to_ptr.vmem [resolvable:$false] %s425_s24 }
  0x40   : > { %220 = vst.msk [vmem:[%s175_s7] sm:$0x3] %vm219_vm0, %v215_v3  ;;  %221 = vst.msk [vmem:[%s175_s7 + $0x2] sm:$0x3] %vm219_vm0, %v216_v7  ;;  %p423_p13 = pnand %p422_p6, %p689_p12  ;;  %s427_s25 = scalar_lea.vmem %s426_s24, 256 }
  0x41   : > { %222 = vst.msk [vmem:[%s175_s7 + $0x4] sm:$0x3] %vm219_vm0, %v217_v8  ;;  %223 = vst.msk [vmem:[%s175_s7 + $0x6] sm:$0x3] %vm219_vm0, %v218_v11  ;;  %p428_p10 = scmp.lt.s32.totalorder %s627_s8, %s426_s24  ;;  %p429_p0 = scmp.lt.s32.totalorder %s427_s25, %s421_s19 }
  0x42   : > { %p424_p8 = pneg %p423_p13 }
  0x43   : > { %p430_p2 = por %p429_p0, %p428_p10 }
  0x45   : > { %p431_p4 = pnand %p430_p2, %p424_p8 }
  0x47   : > { %434 = shalt.err (!%p431_p4)
}
  0x48   : > { %s435_s26 = scalar_lea.hbm %s633_s16, 128  ;;  %s439_s6 = scalar_lea.hbm %s682_s2, 256 }
  0x49   : > { %p436_p5 = scmp.ne.s32.totalorder %s633_s16, %s435_s26  ;;  %p440_p1 = scmp.lt.u32.totalorder %s633_s16, %s682_s2 }
  0x4a   : > { %p441_p3 = scmp.lt.u32.totalorder %s439_s6, %s435_s26  ;;  %p443_p6 = scmp.lt.u32.totalorder %s435_s26, %s633_s16 }
  0x4b   : > { %p437_p7 = pnand %p436_p5, %p689_p12 }
  0x4c   : > { %p442_p11 = por %p441_p3, %p440_p1 }
  0x4d   : > { %p438_p9 = pneg %p437_p7 }
  0x4e   : > { %p444_p13 = por %p443_p6, %p442_p11 }
  0x50   : > { %p445_p8 = pnand %p444_p13, %p438_p9 }
  0x52   : > { %448 = shalt.err (!%p445_p8)
}
  0x53   : > { %s493_s3 = smov 32   ;;  %s494_s4 = smov 2  }
  0x54   : > { %343 = dma.vmem_to_hbm [thread:$0]  (%p689_p12), %s627_s8, 128, %s633_s16, %s225_s17, %s493_s3, %s493_s3, %s494_s4  }
  0x55 PF: > { %s253_s7 = sand.u32 1, %s475_s9   ;;  %p690_p10 = scmp.ne.s32.totalorder %s687_s22, 0 }
  0x56   : > { %p691_p0 = scmp.ge.s32.totalorder %s487_s12, 2  ;;  %s254_s14 = scalar_lea.sflag [#allocation4], %s253_s7 }
  0x58   : > { %p350_p2 = pnand %p691_p0, %p690_p10 }
  0x5a   : > { %470 = dma.done.wait (!%p350_p2), %s254_s14, 128  }
  0x5b   : > { %472 = vsyncadd (!%p350_p2), %s254_s14, 4294967168  ;;  %p15_p4 = scmp.ge.s32.totalorder %s535_s15, 4   ;;  %s692_s9 = smov %s479_s10 }
  0x5c   : > { %s693_s10 = smov %s483_s11  ;;  %s694_s11 = smov %s547_s18 }
  0x5d   : > { %s695_s12 = smov %s535_s15  ;;  %17 = sbr.rel (!%p15_p4) target bundleno = 5 (0x5), region = 76 }
  0x64   :  { %259 = vsyncpa [#allocation3], 1 }
  0x65   :  { %261 = vsyncpa [#allocation3 + $0x1], 1 }
  0x66   :  { %262 = vsyncpa [#allocation4], 1 }
  0x67   :  { %264 = vsyncpa [#allocation4 + $0x1], 1 }

</bundles_post_ra>
